<compile_context>
chip_gen: v7x
topology: tpu7x:2x2x1
jax: 0.10.0
libtpu: 0.0.40
codegen_flags: <defaults>
</compile_context>

<pallas_src>
import functools

import jax
import jax.numpy as jnp
from jax.experimental import pallas as pl
from jax.experimental.pallas import tpu as pltpu


# ---------------------------------------------------------------------------
# Fused kernel: [optional BN+ReLU of previous stage] -> 3x3 conv (pad=1) + bias,
# emitting per-batch packed BN statistics. One grid step = one batch element.
# ---------------------------------------------------------------------------
def _conv3x3_kernel(x_ref, w_ref, b_ref, scale_ref, shift_ref,
                    y_ref, stats_ref, *, H, W, Cout, fuse_bn_relu):
    # x_ref     : (1, H, W*Cin)     f32 (stage 1) / bf16 (stage 2), lane-dense
    # w_ref     : (W*Cin, 3*W*Cout) bf16 banded weights [band dy=0 | dy=1 | dy=2]
    # b_ref     : (1, W*Cout)       f32 conv bias tiled per (w, cout)
    # scale_ref : (1, W*Cin)        f32 fused BN scale of previous stage (tiled)
    # shift_ref : (1, W*Cin)        f32 fused BN shift of previous stage (tiled)
    # y_ref     : (1, H, W*Cout)    bf16 conv output, lane-dense
    # stats_ref : (1, 2, W*Cout)    f32 per-batch [sum ; sum_sq] of conv output
    WC = W * Cout
    x = x_ref[0].astype(jnp.float32)                          # (H, W*Cin)
    if fuse_bn_relu:
        # BN + ReLU of the previous stage, applied to the lane-dense view so the
        # implicit zero padding of the banded weights still sees exact zeros.
        x = jnp.maximum(x * scale_ref[0] + shift_ref[0], 0.0)
    xb = x.astype(jnp.bfloat16)

    # Single MXU GEMM: contraction over the lane-dense (w, cin) axis. Horizontal
    # taps + left/right zero padding are encoded in the band structure of w_ref.
    z = jnp.dot(xb, w_ref[...], preferred_element_type=jnp.float32)   # (H, 3*WC)

    # Vertical taps: kernel-row-0 contribution of input row r lands on output row
    # r+1 (shift down, zero top row = top padding); kernel-row-2 lands on r-1.
    z_k0 = z[:, 0 * WC:1 * WC]
    z_k1 = z[:, 1 * WC:2 * WC]
    z_k2 = z[:, 2 * WC:3 * WC]
    zero_row = jnp.zeros((1, WC), jnp.float32)
    acc = (z_k1
           + jnp.concatenate([zero_row, z_k0[:H - 1, :]], axis=0)
           + jnp.concatenate([z_k2[1:, :], zero_row], axis=0)
           + b_ref[0])                                        # (H, WC) f32

    # Lane-dense store (minor dim = W*Cout = 128 at demo shapes -> unmasked vst).
    y_ref[0] = acc.astype(y_ref.dtype)

    # Packed, lane-dense per-batch BN partials; reduced over N (and the W fold)
    # in the wrapper so the batch grid axis carries no state and stays "parallel".
    s = acc.sum(axis=0, keepdims=True)                        # (1, WC)
    ss = (acc * acc).sum(axis=0, keepdims=True)               # (1, WC)
    stats_ref[0] = jnp.concatenate([s, ss], axis=0)           # (2, WC)


def _conv_stage(x_lane, w_band_bf16, bias_row, scale_row, shift_row,
                *, H, W, Cout, fuse_bn_relu):
    N, _, WCin = x_lane.shape
    WC = W * Cout
    kernel = functools.partial(_conv3x3_kernel, H=H, W=W, Cout=Cout,
                               fuse_bn_relu=fuse_bn_relu)
    y, stats = pl.pallas_call(
        kernel,
        out_shape=(
            jax.ShapeDtypeStruct((N, H, WC), jnp.bfloat16),   # bf16 intermediate
            jax.ShapeDtypeStruct((N, 2, WC), jnp.float32),
        ),
        grid_spec=pltpu.PrefetchScalarGridSpec(
            num_scalar_prefetch=0,
            grid=(N,),
            in_specs=[
                pl.BlockSpec((1, H, WCin), lambda n: (n, 0, 0)),
                pl.BlockSpec((WCin, 3 * WC), lambda n: (0, 0)),
                pl.BlockSpec((1, WC), lambda n: (0, 0)),
                pl.BlockSpec((1, WCin), lambda n: (0, 0)),
                pl.BlockSpec((1, WCin), lambda n: (0, 0)),
            ],
            out_specs=(
                pl.BlockSpec((1, H, WC), lambda n: (n, 0, 0)),
                pl.BlockSpec((1, 2, WC), lambda n: (n, 0, 0)),
            ),
        ),
        compiler_params=pltpu.CompilerParams(
            dimension_semantics=("parallel",)),   # no cross-batch carry -> megacore OK
    )(x_lane, w_band_bf16, bias_row, scale_row, shift_row)
    # Tiny reductions over batch and the W fold in the wrapper.
    stats_c = stats.sum(axis=0).reshape(2, W, Cout).sum(axis=1)   # (2, Cout)
    return y, stats_c[0], stats_c[1]


# ---------------------------------------------------------------------------
# Final BN + ReLU: lane-dense elementwise kernel on the (N, H, W*C) bf16 view.
# ---------------------------------------------------------------------------
def _bn_relu_kernel(x_ref, scale_ref, shift_ref, out_ref):
    out_ref[...] = jnp.maximum(
        x_ref[...].astype(jnp.float32) * scale_ref[0] + shift_ref[0], 0.0)


def _bn_relu_lane_dense(y_bf16, scale_row, shift_row):
    N, H, WC = y_bf16.shape
    return pl.pallas_call(
        _bn_relu_kernel,
        out_shape=jax.ShapeDtypeStruct((N, H, WC), jnp.float32),
        grid_spec=pltpu.PrefetchScalarGridSpec(
            num_scalar_prefetch=0,
            grid=(N,),
            in_specs=[
                pl.BlockSpec((1, H, WC), lambda n: (n, 0, 0)),
                pl.BlockSpec((1, WC), lambda n: (0, 0)),
                pl.BlockSpec((1, WC), lambda n: (0, 0)),
            ],
            out_specs=pl.BlockSpec((1, H, WC), lambda n: (n, 0, 0)),
        ),
        compiler_params=pltpu.CompilerParams(dimension_semantics=("parallel",)),
    )(y_bf16, scale_row, shift_row)


# ---------------------------------------------------------------------------
# Wrapper-side parameter prep
# ---------------------------------------------------------------------------
def _band_conv_weights(w_hwio, W):
    """(3, 3, Cin, Cout) conv weights -> (W*Cin, 3*W*Cout) bf16 banded GEMM matrix.

    Column block dy holds M_dy with
      M_dy[p*Cin+ci, w*Cout+co] = w[dy, p-w+1, ci, co]  if 0 <= p-w+1 < 3 else 0,
    i.e. horizontal taps and the left/right zero padding are encoded in the band.
    """
    kh, kw, Cin, Cout = w_hwio.shape
    p = jnp.arange(W)[:, None]                 # input column
    w = jnp.arange(W)[None, :]                 # output column
    dx = p - w + 1                             # kernel column needed
    valid = (dx >= 0) & (dx < kw)
    g = w_hwio[:, jnp.clip(dx, 0, kw - 1)]     # (3, W, W, Cin, Cout)
    g = jnp.where(valid[None, :, :, None, None], g, 0.0)
    m = g.transpose(0, 1, 3, 2, 4).reshape(kh, W * Cin, W * Cout)
    return m.transpose(1, 0, 2).reshape(W * Cin, kh * W * Cout).astype(jnp.bfloat16)


def _tile_row(vec_c, W):
    """Per-channel vector (C,) -> lane pattern (1, W*C) with index w*C+c -> vec[c]."""
    return jnp.tile(vec_c.reshape(-1), W).reshape(1, -1)


def _bn_scale_shift(s, ss, gamma, beta, cnt, eps=1e-5):
    mean = s / cnt
    var = ss / cnt - mean * mean          # biased batch variance (train-mode forward)
    scale = gamma / jnp.sqrt(var + eps)
    shift = beta - mean * scale
    return scale, shift


def init_conv_block_params(key, in_ch, out_ch):
    k1, k2, k3, k4 = jax.random.split(key, 4)
    fan1, fan2 = in_ch * 9, out_ch * 9
    return {
        # stored as (kh, kw, Cin, Cout) == PyTorch (Cout, Cin, kh, kw).transpose(2, 3, 1, 0)
        "w1": jax.random.normal(k1, (3, 3, in_ch, out_ch), jnp.float32) / jnp.sqrt(fan1),
        "b1": 0.1 * jax.random.normal(k2, (1, out_ch), jnp.float32),
        "g1": jnp.ones((out_ch,), jnp.float32),    # BatchNorm weight (default init)
        "be1": jnp.zeros((out_ch,), jnp.float32),  # BatchNorm bias   (default init)
        "w2": jax.random.normal(k3, (3, 3, out_ch, out_ch), jnp.float32) / jnp.sqrt(fan2),
        "b2": 0.1 * jax.random.normal(k4, (1, out_ch), jnp.float32),
        "g2": jnp.ones((out_ch,), jnp.float32),
        "be2": jnp.zeros((out_ch,), jnp.float32),
    }


# ---------------------------------------------------------------------------
# conv_block forward
# ---------------------------------------------------------------------------
@jax.jit
def conv_block_forward(x_nchw, params):
    N, Cin, H, W = x_nchw.shape
    Cout = params["w1"].shape[-1]
    cnt = jnp.float32(N * H * W)

    # NCHW -> lane-dense (N, H, W*Cin) activation view (row-major, reshape is free).
    x = jnp.transpose(x_nchw, (0, 2, 3, 1)).reshape(N, H, W * Cin).astype(jnp.float32)

    w1 = _band_conv_weights(params["w1"], W)          # (W*Cin,  3*W*Cout) bf16
    w2 = _band_conv_weights(params["w2"], W)          # (W*Cout, 3*W*Cout) bf16
    b1 = _tile_row(params["b1"], W)
    b2 = _tile_row(params["b2"], W)

    ones_in = jnp.ones((1, W * Cin), jnp.float32)
    zeros_in = jnp.zeros((1, W * Cin), jnp.float32)

    # Stage 1: conv1 (+ per-batch BN1 partials). BN1+ReLU deferred & fused into conv2.
    y1, s1, ss1 = _conv_stage(x, w1, b1, ones_in, zeros_in,
                              H=H, W=W, Cout=Cout, fuse_bn_relu=False)
    scale1, shift1 = _bn_scale_shift(s1, ss1, params["g1"], params["be1"], cnt)

    # Stage 2: fused BN1+ReLU -> conv2 (+ per-batch BN2 partials).
    y2, s2, ss2 = _conv_stage(y1, w2, b2,
                              _tile_row(scale1, W), _tile_row(shift1, W),
                              H=H, W=W, Cout=Cout, fuse_bn_relu=True)
    scale2, shift2 = _bn_scale_shift(s2, ss2, params["g2"], params["be2"], cnt)

    # Stage 3: BN2 + ReLU (lane-dense elementwise, bf16 in / f32 out).
    a2 = _bn_relu_lane_dense(y2, _tile_row(scale2, W), _tile_row(shift2, W))

    return jnp.transpose(a2.reshape(N, H, W, Cout), (0, 3, 1, 2))   # NHWC -> NCHW


if __name__ == "__main__":
    key = jax.random.PRNGKey(0)
    k_x, k_p = jax.random.split(key)

    N, in_ch, out_ch, H, W = 2, 4, 8, 16, 16
    x = jax.random.normal(k_x, (N, in_ch, H, W), jnp.float32)
    params = init_conv_block_params(k_p, in_ch, out_ch)

    out = conv_block_forward(x, params)
    jax.block_until_ready(out)

    assert out.shape == (N, out_ch, H, W), out.shape
    assert out.dtype == jnp.float32
    assert bool(jnp.all(jnp.isfinite(out)))
    print("KERNEL_OK")
</pallas_src>

<mosaic_0001>
module attributes {stable_mosaic.version = 11 : i64} {
  func.func @_conv3x3_kernel(%arg0: i32, %arg1: memref<1x16x64xf32, #tpu.memory_space<vmem>>, %arg2: memref<64x384xbf16, #tpu.memory_space<vmem>>, %arg3: memref<1x128xf32, #tpu.memory_space<vmem>>, %arg4: memref<1x64xf32, #tpu.memory_space<vmem>>, %arg5: memref<1x64xf32, #tpu.memory_space<vmem>>, %arg6: memref<1x16x128xbf16, #tpu.memory_space<vmem>>, %arg7: memref<1x2x128xf32, #tpu.memory_space<vmem>>) attributes {dimension_semantics = [#tpu.dimension_semantics<parallel>], iteration_bounds = array<i64: 2>, scalar_prefetch = 0 : i64, scratch_operands = 0 : i64, tpu.core_type = #tpu.core_type<tc>, window_params = [{transform_indices = @transform_0, window_bounds = array<i64: 1, 16, 64>}, {pipeline_mode = #tpu.pipeline_mode<synchronous>, transform_indices = @transform_1, window_bounds = array<i64: 64, 384>}, {pipeline_mode = #tpu.pipeline_mode<synchronous>, transform_indices = @transform_2, window_bounds = array<i64: 1, 128>}, {pipeline_mode = #tpu.pipeline_mode<synchronous>, transform_indices = @transform_3, window_bounds = array<i64: 1, 64>}, {pipeline_mode = #tpu.pipeline_mode<synchronous>, transform_indices = @transform_4, window_bounds = array<i64: 1, 64>}, {transform_indices = @transform_5, window_bounds = array<i64: 1, 16, 128>}, {transform_indices = @transform_6, window_bounds = array<i64: 1, 2, 128>}]} {
    %c0 = arith.constant 0 : index
    %c0_0 = arith.constant 0 : index
    %c0_1 = arith.constant 0 : index
    %0 = vector.load %arg1[%c0, %c0_0, %c0_1] : memref<1x16x64xf32, #tpu.memory_space<vmem>>, vector<1x16x64xf32>
    %1 = vector.shape_cast %0 : vector<1x16x64xf32> to vector<16x64xf32>
    %2 = arith.truncf %1 : vector<16x64xf32> to vector<16x64xbf16>
    %c0_2 = arith.constant 0 : index
    %c0_3 = arith.constant 0 : index
    %3 = vector.load %arg2[%c0_2, %c0_3] : memref<64x384xbf16, #tpu.memory_space<vmem>>, vector<64x384xbf16>
    %cst = arith.constant dense<0.000000e+00> : vector<16x384xf32>
    %4 = tpu.matmul %2, %3, %cst {dimension_numbers = #tpu.dot_dimension_numbers<[1], [0], [0], [1], [0, 0, 1, 1], [], []>} : vector<16x64xbf16>, vector<64x384xbf16>, vector<16x384xf32> -> vector<16x384xf32>
    %5 = vector.extract_strided_slice %4 {offsets = [0, 0], sizes = [16, 128], strides = [1, 1]} : vector<16x384xf32> to vector<16x128xf32>
    %6 = vector.extract_strided_slice %4 {offsets = [0, 128], sizes = [16, 128], strides = [1, 1]} : vector<16x384xf32> to vector<16x128xf32>
    %7 = vector.extract_strided_slice %4 {offsets = [0, 256], sizes = [16, 128], strides = [1, 1]} : vector<16x384xf32> to vector<16x128xf32>
    %cst_4 = arith.constant 0.000000e+00 : f32
    %8 = vector.broadcast %cst_4 : f32 to vector<1x128xf32>
    %9 = vector.extract_strided_slice %5 {offsets = [0, 0], sizes = [15, 128], strides = [1, 1]} : vector<16x128xf32> to vector<15x128xf32>
    %10 = tpu.concatenate %8, %9 in 0 : vector<1x128xf32>, vector<15x128xf32> -> vector<16x128xf32>
    %11 = arith.addf %6, %10 : vector<16x128xf32>
    %12 = vector.extract_strided_slice %7 {offsets = [1, 0], sizes = [15, 128], strides = [1, 1]} : vector<16x128xf32> to vector<15x128xf32>
    %13 = tpu.concatenate %12, %8 in 0 : vector<15x128xf32>, vector<1x128xf32> -> vector<16x128xf32>
    %14 = arith.addf %11, %13 : vector<16x128xf32>
    %c0_5 = arith.constant 0 : index
    %c0_6 = arith.constant 0 : index
    %15 = vector.load %arg3[%c0_5, %c0_6] : memref<1x128xf32, #tpu.memory_space<vmem>>, vector<1x128xf32>
    %16 = vector.shape_cast %15 : vector<1x128xf32> to vector<128xf32>
    %17 = vector.shape_cast %16 : vector<128xf32> to vector<1x128xf32>
    %18 = vector.broadcast %17 : vector<1x128xf32> to vector<16x128xf32>
    %19 = arith.addf %14, %18 : vector<16x128xf32>
    %20 = arith.truncf %19 : vector<16x128xf32> to vector<16x128xbf16>
    %c0_7 = arith.constant 0 : index
    %c0_8 = arith.constant 0 : index
    %c0_9 = arith.constant 0 : index
    %21 = vector.load %arg6[%c0_7, %c0_8, %c0_9] : memref<1x16x128xbf16, #tpu.memory_space<vmem>>, vector<1x16x128xbf16>
    %22 = vector.shape_cast %21 : vector<1x16x128xbf16> to vector<16x128xbf16>
    %23 = vector.shape_cast %20 : vector<16x128xbf16> to vector<1x16x128xbf16>
    tpu.vector_store %arg6[%c0_7, %c0_8, %c0_9], %23 {strides = array<i32>} : memref<1x16x128xbf16, #tpu.memory_space<vmem>>, vector<1x16x128xbf16>,
    %cst_10 = arith.constant dense<0.000000e+00> : vector<128xf32>
    %24 = vector.multi_reduction <add>, %19, %cst_10 [0] : vector<16x128xf32> to vector<128xf32>
    %25 = vector.shape_cast %24 : vector<128xf32> to vector<1x128xf32>
    %26 = arith.mulf %19, %19 : vector<16x128xf32>
    %cst_11 = arith.constant dense<0.000000e+00> : vector<128xf32>
    %27 = vector.multi_reduction <add>, %26, %cst_11 [0] : vector<16x128xf32> to vector<128xf32>
    %28 = vector.shape_cast %27 : vector<128xf32> to vector<1x128xf32>
    %29 = tpu.concatenate %25, %28 in 0 : vector<1x128xf32>, vector<1x128xf32> -> vector<2x128xf32>
    %c0_12 = arith.constant 0 : index
    %c0_13 = arith.constant 0 : index
    %c0_14 = arith.constant 0 : index
    %30 = vector.load %arg7[%c0_12, %c0_13, %c0_14] : memref<1x2x128xf32, #tpu.memory_space<vmem>>, vector<1x2x128xf32>
    %31 = vector.shape_cast %30 : vector<1x2x128xf32> to vector<2x128xf32>
    %32 = vector.shape_cast %29 : vector<2x128xf32> to vector<1x2x128xf32>
    tpu.vector_store %arg7[%c0_12, %c0_13, %c0_14], %32 {strides = array<i32>} : memref<1x2x128xf32, #tpu.memory_space<vmem>>, vector<1x2x128xf32>,
    return
  }
  func.func @transform_0(%arg0: i32) -> (i32, i32, i32) {
    %c0_i32 = arith.constant 0 : i32
    %c0_i32_0 = arith.constant 0 : i32
    %c0_i32_1 = arith.constant 0 : i32
    return %arg0, %c0_i32, %c0_i32_0 : i32, i32, i32
  }
  func.func @transform_1(%arg0: i32) -> (i32, i32) {
    %c0_i32 = arith.constant 0 : i32
    %c0_i32_0 = arith.constant 0 : i32
    %c0_i32_1 = arith.constant 0 : i32
    return %c0_i32, %c0_i32_0 : i32, i32
  }
  func.func @transform_2(%arg0: i32) -> (i32, i32) {
    %c0_i32 = arith.constant 0 : i32
    %c0_i32_0 = arith.constant 0 : i32
    %c0_i32_1 = arith.constant 0 : i32
    return %c0_i32, %c0_i32_0 : i32, i32
  }
  func.func @transform_3(%arg0: i32) -> (i32, i32) {
    %c0_i32 = arith.constant 0 : i32
    %c0_i32_0 = arith.constant 0 : i32
    %c0_i32_1 = arith.constant 0 : i32
    return %c0_i32, %c0_i32_0 : i32, i32
  }
  func.func @transform_4(%arg0: i32) -> (i32, i32) {
    %c0_i32 = arith.constant 0 : i32
    %c0_i32_0 = arith.constant 0 : i32
    %c0_i32_1 = arith.constant 0 : i32
    return %c0_i32, %c0_i32_0 : i32, i32
  }
  func.func @transform_5(%arg0: i32) -> (i32, i32, i32) {
    %c0_i32 = arith.constant 0 : i32
    %c0_i32_0 = arith.constant 0 : i32
    %c0_i32_1 = arith.constant 0 : i32
    return %arg0, %c0_i32, %c0_i32_0 : i32, i32, i32
  }
  func.func @transform_6(%arg0: i32) -> (i32, i32, i32) {
    %c0_i32 = arith.constant 0 : i32
    %c0_i32_0 = arith.constant 0 : i32
    %c0_i32_1 = arith.constant 0 : i32
    return %arg0, %c0_i32, %c0_i32_0 : i32, i32, i32
  }
}

module attributes {stable_mosaic.version = 11 : i64} {
  func.func @_conv3x3_kernel(%arg0: i32, %arg1: memref<1x16x128xbf16, #tpu.memory_space<vmem>>, %arg2: memref<128x384xbf16, #tpu.memory_space<vmem>>, %arg3: memref<1x128xf32, #tpu.memory_space<vmem>>, %arg4: memref<1x128xf32, #tpu.memory_space<vmem>>, %arg5: memref<1x128xf32, #tpu.memory_space<vmem>>, %arg6: memref<1x16x128xbf16, #tpu.memory_space<vmem>>, %arg7: memref<1x2x128xf32, #tpu.memory_space<vmem>>) attributes {dimension_semantics = [#tpu.dimension_semantics<parallel>], iteration_bounds = array<i64: 2>, scalar_prefetch = 0 : i64, scratch_operands = 0 : i64, tpu.core_type = #tpu.core_type<tc>, window_params = [{transform_indices = @transform_0, window_bounds = array<i64: 1, 16, 128>}, {pipeline_mode = #tpu.pipeline_mode<synchronous>, transform_indices = @transform_1, window_bounds = array<i64: 128, 384>}, {pipeline_mode = #tpu.pipeline_mode<synchronous>, transform_indices = @transform_2, window_bounds = array<i64: 1, 128>}, {pipeline_mode = #tpu.pipeline_mode<synchronous>, transform_indices = @transform_3, window_bounds = array<i64: 1, 128>}, {pipeline_mode = #tpu.pipeline_mode<synchronous>, transform_indices = @transform_4, window_bounds = array<i64: 1, 128>}, {transform_indices = @transform_5, window_bounds = array<i64: 1, 16, 128>}, {transform_indices = @transform_6, window_bounds = array<i64: 1, 2, 128>}]} {
    %c0 = arith.constant 0 : index
    %c0_0 = arith.constant 0 : index
    %c0_1 = arith.constant 0 : index
    %0 = vector.load %arg1[%c0, %c0_0, %c0_1] : memref<1x16x128xbf16, #tpu.memory_space<vmem>>, vector<1x16x128xbf16>
    %1 = vector.shape_cast %0 : vector<1x16x128xbf16> to vector<16x128xbf16>
    %2 = arith.extf %1 : vector<16x128xbf16> to vector<16x128xf32>
    %c0_2 = arith.constant 0 : index
    %c0_3 = arith.constant 0 : index
    %3 = vector.load %arg4[%c0_2, %c0_3] : memref<1x128xf32, #tpu.memory_space<vmem>>, vector<1x128xf32>
    %4 = vector.shape_cast %3 : vector<1x128xf32> to vector<128xf32>
    %5 = vector.shape_cast %4 : vector<128xf32> to vector<1x128xf32>
    %6 = vector.broadcast %5 : vector<1x128xf32> to vector<16x128xf32>
    %7 = arith.mulf %2, %6 : vector<16x128xf32>
    %c0_4 = arith.constant 0 : index
    %c0_5 = arith.constant 0 : index
    %8 = vector.load %arg5[%c0_4, %c0_5] : memref<1x128xf32, #tpu.memory_space<vmem>>, vector<1x128xf32>
    %9 = vector.shape_cast %8 : vector<1x128xf32> to vector<128xf32>
    %10 = vector.shape_cast %9 : vector<128xf32> to vector<1x128xf32>
    %11 = vector.broadcast %10 : vector<1x128xf32> to vector<16x128xf32>
    %12 = arith.addf %7, %11 : vector<16x128xf32>
    %cst = arith.constant 0.000000e+00 : f32
    %13 = vector.broadcast %cst : f32 to vector<16x128xf32>
    %14 = arith.maximumf %12, %13 : vector<16x128xf32>
    %15 = arith.truncf %14 : vector<16x128xf32> to vector<16x128xbf16>
    %c0_6 = arith.constant 0 : index
    %c0_7 = arith.constant 0 : index
    %16 = vector.load %arg2[%c0_6, %c0_7] : memref<128x384xbf16, #tpu.memory_space<vmem>>, vector<128x384xbf16>
    %cst_8 = arith.constant dense<0.000000e+00> : vector<16x384xf32>
    %17 = tpu.matmul %15, %16, %cst_8 {dimension_numbers = #tpu.dot_dimension_numbers<[1], [0], [0], [1], [0, 0, 1, 1], [], []>} : vector<16x128xbf16>, vector<128x384xbf16>, vector<16x384xf32> -> vector<16x384xf32>
    %18 = vector.extract_strided_slice %17 {offsets = [0, 0], sizes = [16, 128], strides = [1, 1]} : vector<16x384xf32> to vector<16x128xf32>
    %19 = vector.extract_strided_slice %17 {offsets = [0, 128], sizes = [16, 128], strides = [1, 1]} : vector<16x384xf32> to vector<16x128xf32>
    %20 = vector.extract_strided_slice %17 {offsets = [0, 256], sizes = [16, 128], strides = [1, 1]} : vector<16x384xf32> to vector<16x128xf32>
    %cst_9 = arith.constant 0.000000e+00 : f32
    %21 = vector.broadcast %cst_9 : f32 to vector<1x128xf32>
    %22 = vector.extract_strided_slice %18 {offsets = [0, 0], sizes = [15, 128], strides = [1, 1]} : vector<16x128xf32> to vector<15x128xf32>
    %23 = tpu.concatenate %21, %22 in 0 : vector<1x128xf32>, vector<15x128xf32> -> vector<16x128xf32>
    %24 = arith.addf %19, %23 : vector<16x128xf32>
    %25 = vector.extract_strided_slice %20 {offsets = [1, 0], sizes = [15, 128], strides = [1, 1]} : vector<16x128xf32> to vector<15x128xf32>
    %26 = tpu.concatenate %25, %21 in 0 : vector<15x128xf32>, vector<1x128xf32> -> vector<16x128xf32>
    %27 = arith.addf %24, %26 : vector<16x128xf32>
    %c0_10 = arith.constant 0 : index
    %c0_11 = arith.constant 0 : index
    %28 = vector.load %arg3[%c0_10, %c0_11] : memref<1x128xf32, #tpu.memory_space<vmem>>, vector<1x128xf32>
    %29 = vector.shape_cast %28 : vector<1x128xf32> to vector<128xf32>
    %30 = vector.shape_cast %29 : vector<128xf32> to vector<1x128xf32>
    %31 = vector.broadcast %30 : vector<1x128xf32> to vector<16x128xf32>
    %32 = arith.addf %27, %31 : vector<16x128xf32>
    %33 = arith.truncf %32 : vector<16x128xf32> to vector<16x128xbf16>
    %c0_12 = arith.constant 0 : index
    %c0_13 = arith.constant 0 : index
    %c0_14 = arith.constant 0 : index
    %34 = vector.load %arg6[%c0_12, %c0_13, %c0_14] : memref<1x16x128xbf16, #tpu.memory_space<vmem>>, vector<1x16x128xbf16>
    %35 = vector.shape_cast %34 : vector<1x16x128xbf16> to vector<16x128xbf16>
    %36 = vector.shape_cast %33 : vector<16x128xbf16> to vector<1x16x128xbf16>
    tpu.vector_store %arg6[%c0_12, %c0_13, %c0_14], %36 {strides = array<i32>} : memref<1x16x128xbf16, #tpu.memory_space<vmem>>, vector<1x16x128xbf16>,
    %cst_15 = arith.constant dense<0.000000e+00> : vector<128xf32>
    %37 = vector.multi_reduction <add>, %32, %cst_15 [0] : vector<16x128xf32> to vector<128xf32>
    %38 = vector.shape_cast %37 : vector<128xf32> to vector<1x128xf32>
    %39 = arith.mulf %32, %32 : vector<16x128xf32>
    %cst_16 = arith.constant dense<0.000000e+00> : vector<128xf32>
    %40 = vector.multi_reduction <add>, %39, %cst_16 [0] : vector<16x128xf32> to vector<128xf32>
    %41 = vector.shape_cast %40 : vector<128xf32> to vector<1x128xf32>
    %42 = tpu.concatenate %38, %41 in 0 : vector<1x128xf32>, vector<1x128xf32> -> vector<2x128xf32>
    %c0_17 = arith.constant 0 : index
    %c0_18 = arith.constant 0 : index
    %c0_19 = arith.constant 0 : index
    %43 = vector.load %arg7[%c0_17, %c0_18, %c0_19] : memref<1x2x128xf32, #tpu.memory_space<vmem>>, vector<1x2x128xf32>
    %44 = vector.shape_cast %43 : vector<1x2x128xf32> to vector<2x128xf32>
    %45 = vector.shape_cast %42 : vector<2x128xf32> to vector<1x2x128xf32>
    tpu.vector_store %arg7[%c0_17, %c0_18, %c0_19], %45 {strides = array<i32>} : memref<1x2x128xf32, #tpu.memory_space<vmem>>, vector<1x2x128xf32>,
    return
  }
  func.func @transform_0(%arg0: i32) -> (i32, i32, i32) {
    %c0_i32 = arith.constant 0 : i32
    %c0_i32_0 = arith.constant 0 : i32
    %c0_i32_1 = arith.constant 0 : i32
    return %arg0, %c0_i32, %c0_i32_0 : i32, i32, i32
  }
  func.func @transform_1(%arg0: i32) -> (i32, i32) {
    %c0_i32 = arith.constant 0 : i32
    %c0_i32_0 = arith.constant 0 : i32
    %c0_i32_1 = arith.constant 0 : i32
    return %c0_i32, %c0_i32_0 : i32, i32
  }
  func.func @transform_2(%arg0: i32) -> (i32, i32) {
    %c0_i32 = arith.constant 0 : i32
    %c0_i32_0 = arith.constant 0 : i32
    %c0_i32_1 = arith.constant 0 : i32
    return %c0_i32, %c0_i32_0 : i32, i32
  }
  func.func @transform_3(%arg0: i32) -> (i32, i32) {
    %c0_i32 = arith.constant 0 : i32
    %c0_i32_0 = arith.constant 0 : i32
    %c0_i32_1 = arith.constant 0 : i32
    return %c0_i32, %c0_i32_0 : i32, i32
  }
  func.func @transform_4(%arg0: i32) -> (i32, i32) {
    %c0_i32 = arith.constant 0 : i32
    %c0_i32_0 = arith.constant 0 : i32
    %c0_i32_1 = arith.constant 0 : i32
    return %c0_i32, %c0_i32_0 : i32, i32
  }
  func.func @transform_5(%arg0: i32) -> (i32, i32, i32) {
    %c0_i32 = arith.constant 0 : i32
    %c0_i32_0 = arith.constant 0 : i32
    %c0_i32_1 = arith.constant 0 : i32
    return %arg0, %c0_i32, %c0_i32_0 : i32, i32, i32
  }
  func.func @transform_6(%arg0: i32) -> (i32, i32, i32) {
    %c0_i32 = arith.constant 0 : i32
    %c0_i32_0 = arith.constant 0 : i32
    %c0_i32_1 = arith.constant 0 : i32
    return %arg0, %c0_i32, %c0_i32_0 : i32, i32, i32
  }
}

module attributes {stable_mosaic.version = 11 : i64} {
  func.func @_bn_relu_kernel(%arg0: i32, %arg1: memref<1x16x128xbf16, #tpu.memory_space<vmem>>, %arg2: memref<1x128xf32, #tpu.memory_space<vmem>>, %arg3: memref<1x128xf32, #tpu.memory_space<vmem>>, %arg4: memref<1x16x128xf32, #tpu.memory_space<vmem>>) attributes {dimension_semantics = [#tpu.dimension_semantics<parallel>], iteration_bounds = array<i64: 2>, scalar_prefetch = 0 : i64, scratch_operands = 0 : i64, tpu.core_type = #tpu.core_type<tc>, window_params = [{transform_indices = @transform_0, window_bounds = array<i64: 1, 16, 128>}, {pipeline_mode = #tpu.pipeline_mode<synchronous>, transform_indices = @transform_1, window_bounds = array<i64: 1, 128>}, {pipeline_mode = #tpu.pipeline_mode<synchronous>, transform_indices = @transform_2, window_bounds = array<i64: 1, 128>}, {transform_indices = @transform_3, window_bounds = array<i64: 1, 16, 128>}]} {
    %c0 = arith.constant 0 : index
    %c0_0 = arith.constant 0 : index
    %c0_1 = arith.constant 0 : index
    %0 = vector.load %arg1[%c0, %c0_0, %c0_1] : memref<1x16x128xbf16, #tpu.memory_space<vmem>>, vector<1x16x128xbf16>
    %1 = arith.extf %0 : vector<1x16x128xbf16> to vector<1x16x128xf32>
    %c0_2 = arith.constant 0 : index
    %c0_3 = arith.constant 0 : index
    %2 = vector.load %arg2[%c0_2, %c0_3] : memref<1x128xf32, #tpu.memory_space<vmem>>, vector<1x128xf32>
    %3 = vector.shape_cast %2 : vector<1x128xf32> to vector<128xf32>
    %4 = vector.shape_cast %3 : vector<128xf32> to vector<1x1x128xf32>
    %5 = vector.broadcast %4 : vector<1x1x128xf32> to vector<1x16x128xf32>
    %6 = arith.mulf %1, %5 : vector<1x16x128xf32>
    %c0_4 = arith.constant 0 : index
    %c0_5 = arith.constant 0 : index
    %7 = vector.load %arg3[%c0_4, %c0_5] : memref<1x128xf32, #tpu.memory_space<vmem>>, vector<1x128xf32>
    %8 = vector.shape_cast %7 : vector<1x128xf32> to vector<128xf32>
    %9 = vector.shape_cast %8 : vector<128xf32> to vector<1x1x128xf32>
    %10 = vector.broadcast %9 : vector<1x1x128xf32> to vector<1x16x128xf32>
    %11 = arith.addf %6, %10 : vector<1x16x128xf32>
    %cst = arith.constant 0.000000e+00 : f32
    %12 = vector.broadcast %cst : f32 to vector<1x16x128xf32>
    %13 = arith.maximumf %11, %12 : vector<1x16x128xf32>
    %c0_6 = arith.constant 0 : index
    %c0_7 = arith.constant 0 : index
    %c0_8 = arith.constant 0 : index
    %14 = vector.load %arg4[%c0_6, %c0_7, %c0_8] : memref<1x16x128xf32, #tpu.memory_space<vmem>>, vector<1x16x128xf32>
    tpu.vector_store %arg4[%c0_6, %c0_7, %c0_8], %13 {strides = array<i32>} : memref<1x16x128xf32, #tpu.memory_space<vmem>>, vector<1x16x128xf32>,
    return
  }
  func.func @transform_0(%arg0: i32) -> (i32, i32, i32) {
    %c0_i32 = arith.constant 0 : i32
    %c0_i32_0 = arith.constant 0 : i32
    %c0_i32_1 = arith.constant 0 : i32
    return %arg0, %c0_i32, %c0_i32_0 : i32, i32, i32
  }
  func.func @transform_1(%arg0: i32) -> (i32, i32) {
    %c0_i32 = arith.constant 0 : i32
    %c0_i32_0 = arith.constant 0 : i32
    %c0_i32_1 = arith.constant 0 : i32
    return %c0_i32, %c0_i32_0 : i32, i32
  }
  func.func @transform_2(%arg0: i32) -> (i32, i32) {
    %c0_i32 = arith.constant 0 : i32
    %c0_i32_0 = arith.constant 0 : i32
    %c0_i32_1 = arith.constant 0 : i32
    return %c0_i32, %c0_i32_0 : i32, i32
  }
  func.func @transform_3(%arg0: i32) -> (i32, i32, i32) {
    %c0_i32 = arith.constant 0 : i32
    %c0_i32_0 = arith.constant 0 : i32
    %c0_i32_1 = arith.constant 0 : i32
    return %arg0, %c0_i32, %c0_i32_0 : i32, i32, i32
  }
}

</mosaic_0001>

<bundles_post_ra>
// kernel: tile.30
= control target key start
LH: loop header
LB: loop body
LE: loop exit
PB: predicated region body
PF: predicated region fallthrough
CT: control target
= control target key end

     0   :  { %s28_s0 = inlined_call_operand.vmem [shape: f32[8], index: 0, kind: input, shape index: {}]   ;;  %s29_s1 = inlined_call_operand.vmem [shape: f32[16,8], index: 1, kind: output, shape index: {}]  }
   0x1   :  { %v4_v0 = vld [vmem:[%s28_s0] ss:$0 sm:$0xff] }
   0x2   :  { %5 = vst [vmem:[%s29_s1] sm:$0xff] %v4_v0  ;;  %8 = vst [vmem:[%s29_s1 + $0x8] sm:$0xff] %v4_v0 }

// kernel: tile.31
= control target key start
LH: loop header
LB: loop body
LE: loop exit
PB: predicated region body
PF: predicated region fallthrough
CT: control target
= control target key end

     0   :  { %s131_s10 = smov 120   ;;  %s132_s11 = smov 104   ;;  %vm3_vm0 = vcmask 64512   ;;  %vm9_vm1 = vcmask 1048512   ;;  %vm15_vm2 = vcmask 982912   ;;  %vm21_vm3 = vcmask 917312   ;;  %s207_s0 = inlined_call_operand.vmem [shape: f32[16,8], index: 0, kind: input, shape index: {}]   ;;  %s208_s1 = inlined_call_operand.vmem [shape: f32[1,128], index: 1, kind: output, shape index: {}]  }
   0x1   :  { %v101_v0 = vld [vmem:[%s207_s0 + $0xf] sm:$0x1]   ;;  %v103_v1 = vld [vmem:[%s207_s0 + $0xd] sm:$0x1]   ;;  %v102_v2 = vld [vmem:[%s207_s0 + $0xe] sm:$0x1]  }
   0x2   :  { %7 = vrot.lane.b32.xlu0 %v101_v0, %s131_s10  ;;  %19 = vrot.lane.b32.xlu1 %v103_v1, %s132_s11  ;;  %v104_v3 = vld [vmem:[%s207_s0 + $0xc] sm:$0x1]   ;;  %s133_s16 = smov 112   ;;  %s134_s17 = smov 96   ;;  %v105_v4 = vld [vmem:[%s207_s0 + $0xb] sm:$0x1]  }
   0x3   :  { %v106_v5 = vld [vmem:[%s207_s0 + $0xa] sm:$0x1]   ;;  %v2_v6 = vld [vmem:[%s207_s0] sm:$0x1]   ;;  %s135_s24 = smov 88   ;;  %s136_s25 = smov 80  }
   0x4   :  { %4 = vst.msk [vmem:[#allocation0] sm:$0x1] %vm3_vm0, %v2_v6   ;;  %v107_v7 = vld [vmem:[%s207_s0 + $0x9] sm:$0x1]   ;;  %v108_v8 = vld [vmem:[%s207_s0 + $0x8] sm:$0x1]  }
   0x5   :  { %s137_s30 = smov 72   ;;  %s138_s2 = smov 64   ;;  %v109_v9 = vld [vmem:[%s207_s0 + $0x7] sm:$0x1]   ;;  %v110_v10 = vld [vmem:[%s207_s0 + $0x6] sm:$0x1]  }
   0x6   :  { %13 = vrot.lane.b32.xlu0 %v102_v2, %s133_s16  ;;  %25 = vrot.lane.b32.xlu1 %v104_v3, %s134_s17  ;;  %s139_s7 = smov 56   ;;  %s140_s8 = smov 48   ;;  %v111_v11 = vld [vmem:[%s207_s0 + $0x5] sm:$0x1]   ;;  %v112_v12 = vld [vmem:[%s207_s0 + $0x4] sm:$0x1]  }
   0x7   :  { %s141_s13 = smov 40   ;;  %s142_s14 = smov 32   ;;  %v113_v13 = vld [vmem:[%s207_s0 + $0x3] sm:$0x1]   ;;  %v114_v14 = vld [vmem:[%s207_s0 + $0x2] sm:$0x1]  }
   0x8   :  { %s143_s19 = smov 24   ;;  %s144_s20 = smov 16   ;;  %v115_v15 = vld [vmem:[%s207_s0 + $0x1] sm:$0x1]   ;;  %vm27_vm4 = vcmask 851712   ;;  %vm33_vm5 = vcmask 786112  }
   0x9   :  { %s145_s0 = smov 8   ;;  %vm39_vm6 = vcmask 720512   ;;  %vm45_vm7 = vcmask 654912   ;;  %vm51_vm8 = vcmask 589312   ;;  %vm57_vm9 = vcmask 523712  }
   0xa   :  { %31 = vrot.lane.b32.xlu0 %v105_v4, %s135_s24  ;;  %37 = vrot.lane.b32.xlu1 %v106_v5, %s136_s25  ;;  %vm63_vm10 = vcmask 458112   ;;  %vm69_vm11 = vcmask 392512   ;;  %vm75_vm12 = vcmask 326912   ;;  %vm81_vm13 = vcmask 261312  }
   0xb   :  { %vm87_vm14 = vcmask 195712   ;;  %vm93_vm15 = vcmask 130112  }
   0xe   :  { %43 = vrot.lane.b32.xlu0 %v107_v7, %s137_s30  ;;  %49 = vrot.lane.b32.xlu1 %v108_v8, %s138_s2 }
  0x12   :  { %55 = vrot.lane.b32.xlu0 %v109_v9, %s139_s7  ;;  %61 = vrot.lane.b32.xlu1 %v110_v10, %s140_s8 }
  0x16   :  { %67 = vrot.lane.b32.xlu0 %v111_v11, %s141_s13  ;;  %73 = vrot.lane.b32.xlu1 %v112_v12, %s142_s14 }
  0x1a   :  { %79 = vrot.lane.b32.xlu0 %v113_v13, %s143_s19  ;;  %85 = vrot.lane.b32.xlu1 %v114_v14, %s144_s20 }
  0x1e   :  { %91 = vrot.lane.b32.xlu0 %v115_v15, %s145_s0 }
  0x74   :  { %v8_v16 = vpop.permute.xlu0 %7   ;;  %v20_v17 = vpop.permute.xlu1 %19  }
  0x75   :  { %10 = vst.msk [vmem:[#allocation0] sm:$0x1] %vm9_vm1, %v8_v16  }
  0x78   :  { %v14_v18 = vpop.permute.xlu0 %13   ;;  %v26_v19 = vpop.permute.xlu1 %25  }
  0x79   :  { %16 = vst.msk [vmem:[#allocation0] sm:$0x1] %vm15_vm2, %v14_v18  }
  0x7a   :  { %22 = vst.msk [vmem:[#allocation0] sm:$0x1] %vm21_vm3, %v20_v17  }
  0x7b   :  { %28 = vst.msk [vmem:[#allocation0] sm:$0x1] %vm27_vm4, %v26_v19  }
  0x7c   :  { %v32_v20 = vpop.permute.xlu0 %31   ;;  %v38_v21 = vpop.permute.xlu1 %37  }
  0x7d   :  { %34 = vst.msk [vmem:[#allocation0] sm:$0x1] %vm33_vm5, %v32_v20  }
  0x7e   :  { %40 = vst.msk [vmem:[#allocation0] sm:$0x1] %vm39_vm6, %v38_v21  }
  0x80   :  { %v44_v22 = vpop.permute.xlu0 %43   ;;  %v50_v23 = vpop.permute.xlu1 %49  }
  0x81   :  { %46 = vst.msk [vmem:[#allocation0] sm:$0x1] %vm45_vm7, %v44_v22  }
  0x82   :  { %52 = vst.msk [vmem:[#allocation0] sm:$0x1] %vm51_vm8, %v50_v23  }
  0x84   :  { %v56_v24 = vpop.permute.xlu0 %55   ;;  %v62_v25 = vpop.permute.xlu1 %61  }
  0x85   :  { %58 = vst.msk [vmem:[#allocation0] sm:$0x1] %vm57_vm9, %v56_v24  }
  0x86   :  { %64 = vst.msk [vmem:[#allocation0] sm:$0x1] %vm63_vm10, %v62_v25  }
  0x88   :  { %v68_v26 = vpop.permute.xlu0 %67   ;;  %v74_v27 = vpop.permute.xlu1 %73  }
  0x89   :  { %70 = vst.msk [vmem:[#allocation0] sm:$0x1] %vm69_vm11, %v68_v26  }
  0x8a   :  { %76 = vst.msk [vmem:[#allocation0] sm:$0x1] %vm75_vm12, %v74_v27  }
  0x8c   :  { %v80_v28 = vpop.permute.xlu0 %79   ;;  %v86_v29 = vpop.permute.xlu1 %85  }
  0x8d   :  { %82 = vst.msk [vmem:[#allocation0] sm:$0x1] %vm81_vm13, %v80_v28  }
  0x8e   :  { %88 = vst.msk [vmem:[#allocation0] sm:$0x1] %vm87_vm14, %v86_v29  }
  0x90   :  { %v92_v30 = vpop.permute.xlu0 %91  }
  0x91   :  { %94 = vst.msk [vmem:[#allocation0] sm:$0x1] %vm93_vm15, %v92_v30  }
  0x98   :  { %v98_v31 = vld [vmem:[#allocation0] sm:$0x1] }
  0x99   :  { %100 = vst [vmem:[%s208_s1] sm:$0x1] %v98_v31 }

// kernel: conv_block_forward.3
= control target key start
LH: loop header
LB: loop body
LE: loop exit
PB: predicated region body
PF: predicated region fallthrough
CT: control target
= control target key end

     0   :  { %s708_s21 = smov 0   ;;  %s775_s0 = inlined_call_operand.vmem [shape: f32[2,16,64], index: 0, kind: input, shape index: {}]   ;;  %s776_s1 = inlined_call_operand.vmem [shape: bf16[64,384], index: 1, kind: input, shape index: {}]   ;;  %s777_s2 = inlined_call_operand.vmem [shape: f32[1,128], index: 2, kind: input, shape index: {}]   ;;  %s778_s3 = inlined_call_operand.vmem [shape: f32[1,64], index: 3, kind: input, shape index: {}]   ;;  %s779_s4 = inlined_call_operand.vmem [shape: f32[1,64], index: 4, kind: input, shape index: {}]   ;;  %s780_s5 = inlined_call_operand.vmem [shape: bf16[2,16,128], index: 5, kind: output, shape index: {0}]   ;;  %s781_s6 = inlined_call_operand.vmem [shape: f32[2,2,128], index: 6, kind: output, shape index: {1}]  }
   0x1 LB: > { %s580_s3 = sadd.s32 4294967295, %s668_s21   ;;  %p584_p0 = scmp.ge.s32.totalorder %s668_s21, 1  ;;  %s668_s21 = sphi %s708_s21, %s17_s21  }
   0x2   : > { %p215_p1 = scmp.lt.s32.totalorder %s668_s21, 3 }
   0x4   : > { %p216_p2 = pnand %p584_p0, %p215_p1 }
   0x5   : > { %v646_v0 = vld [vmem:[%s776_s1 + $0x4] ss:$12 sps:$4 sm:$0xff] (!%p216_p2)   ;;  %v670_v1 = vmov (!%p216_p2), 0.0   ;;  %v648_v2 = vld [vmem:[%s776_s1 + $0x8] ss:$12 sps:$4 sm:$0xff] (!%p216_p2)   ;;  %vm671_vm0 = vmmov (!%p216_p2), 0  }
   0x6   : > { %219 = sbr.rel (%p216_p2) target bundleno = 264 (0x108), region = 40  ;;  %623 = vmatprep.subr.bf16.mxu1 (!%p216_p2), %v670_v1  ;;  %631 = vmatprep.mubr.msk.bf16.mxu1 (!%p216_p2), %vm671_vm0, %v670_v1  ;;  %v649_v3 = vld [vmem:[%s776_s1] ss:$12 sps:$4 sm:$0xff] (!%p216_p2)   ;;  %p249_p3 = scmp.lt.s32.totalorder (!%p216_p2), %s580_s3, 1  ;;  %v650_v4 = vld [vmem:[%s776_s1 + $0x1c] ss:$12 sps:$4 sm:$0xff] (!%p216_p2)  }
   0x7   : > { %351 = vmatprep.subr.bf16.mxu0 (!%p216_p2), %v646_v0  ;;  %624 = vmatpush3.bf16.msra.mxu1 (!%p216_p2), %v648_v2  ;;  %v672_v5 = vmov (!%p216_p2), 0   ;;  %v652_v6 = vld [vmem:[%s776_s1 + $0x20] ss:$12 sps:$4 sm:$0xff] (!%p216_p2)   ;;  %v653_v7 = vld [vmem:[%s776_s1 + $0x18] ss:$12 sps:$4 sm:$0xff] (!%p216_p2)   ;;  %vm347_vm1 = vcmask (!%p216_p2), 523264  }
   0x8   : > { %383 = vmatprep.mubr.bf16.mxu0 (!%p216_p2), %v672_v5  ;;  %352 = vmatpush1.bf16.msra.mxu0 (!%p216_p2), %v649_v3  ;;  %v654_v8 = vld [vmem:[%s776_s1 + $0x34] ss:$12 sps:$4 sm:$0xff] (!%p216_p2)   ;;  %v656_v9 = vld [vmem:[%s776_s1 + $0x38] ss:$12 sps:$4 sm:$0xff] (!%p216_p2)   ;;  %v657_v10 = vld [vmem:[%s776_s1 + $0x30] ss:$12 sps:$4 sm:$0xff] (!%p216_p2)  }
   0x9   : > { %625 = vmatprep.subr.bf16.mxu1 (!%p216_p2), %v670_v1  ;;  %353 = vmatprep.subr.bf16.mxu0 (!%p216_p2), %v650_v4  ;;  %v658_v11 = vld [vmem:[%s776_s1 + $0x4c] ss:$12 sps:$4 sm:$0xff] (!%p216_p2)   ;;  %v660_v12 = vld [vmem:[%s776_s1 + $0x50] ss:$12 sps:$4 sm:$0xff] (!%p216_p2)   ;;  %v661_v15 = vld [vmem:[%s776_s1 + $0x48] ss:$12 sps:$4 sm:$0xff] (!%p216_p2)  }
   0xa   : > { %vm437_vm2 = vcmask (!%p216_p2), 1040384   ;;  %vm448_vm3 = vcmask (!%p216_p2), 1046528   ;;  %v604_v33 = vld [vmem:[%s777_s2] ss:$0 sm:$0xff] (!%p216_p2) }
   0xb   : > { %626 = vmatpush3.bf16.msra.mxu1 (!%p216_p2), %v652_v6 }
   0xc   : > { %354 = vmatpush1.bf16.msra.mxu0 (!%p216_p2), %v653_v7  ;;  %627 = vmatprep.subr.bf16.mxu1 (!%p216_p2), %v670_v1 }
   0xd   : > { %s783_s3 = smov (!%p249_p3, %s580_s3), 1  ;;  %355 = vmatprep.subr.bf16.mxu0 %v654_v8 }
   0xe   : > { %s609_s13 = sshll.u32 %s783_s3, 4  ;;  %s610_s27 = sshll.u32 %s783_s3, 3 }
   0xf   : > { %s253_s18 = scalar_lea.vmem %s775_s0, %s609_s13  ;;  %628 = vmatpush3.bf16.msra.mxu1 %v656_v9  ;;  %s258_s30 = scalar_lea.vmem %s780_s5, %s610_s27 }
  0x10   : > { %v264_v13 = vld [vmem:[%s253_s18] sm:$0xff]  ;;  %v265_v14 = vld [vmem:[%s253_s18 + $0x8] sm:$0xff]  ;;  %356 = vmatpush1.bf16.msra.mxu0 %v657_v10  ;;  %629 = vmatprep.subr.bf16.mxu1 %v670_v1  ;;  %s589_s7 = sshll.u32 %s783_s3, 1 }
  0x11   : > { %357 = vmatprep.subr.bf16.mxu0 %v658_v11  ;;  %v266_v16 = vpack.c.bf16 %v265_v14, %v264_v13  ;;  %s262_s10 = scalar_lea.vmem %s781_s6, %s589_s7 }
  0x13   : > { %630 = vmatpush3.bf16.msra.mxu1 %v660_v12 }
  0x14   : > { %358 = vmatpush1.bf16.msra.mxu0 %v661_v15 }
  0x16   : > { %632 = vmatmul.mubr.msk.bf16.vlgmr.msra.gmra.mrb[0].mxu1 %vm347_vm1, %v266_v16 }
  0x17   : > { %602 = vmatmul.mubr.msk.bf16.vlgmr.msra.gmra.mrb[0].mxu0 %vm347_vm1, %v266_v16 }
  0xe9   : > { %v428_v17 = vpop.f32.mrb[0].mxu1 }
  0xea   : > { %v449_v18 = vrot.slane %v428_v17, 1  ;;  %v385_v19 = vpop.f32.mrb[0].mxu0  ;;  %v633_v20 = vpop.f32.mrb[1].mxu1 }
  0xeb   : > { %v438_v21 = vrot.slane %v385_v19, 7  ;;  %v387_v22 = vpop.f32.mrb[1].mxu0  ;;  %v431_v23 = vpop.f32.mrb[2].mxu1 }
  0xec   : > { %v450_v24 = vrot.slane %v431_v23, 1  ;;  %v389_v25 = vpop.f32.mrb[2].mxu0  ;;  %v634_v26 = vpop.f32.mrb[3].mxu1 }
  0xed   : > { %v443_v27 = vsel %vm437_vm2, 0.0, %v438_v21  ;;  %v439_v28 = vrot.slane %v389_v25, 7  ;;  %v391_v29 = vpop.f32.mrb[3].mxu0 }
  0xee   : > { %v444_v30 = vadd.f32 %v443_v27, %v387_v22  ;;  %v451_v31 = vsel %vm448_vm3, %v449_v18, %v450_v24  ;;  %v454_v36 = vsel %vm448_vm3, %v450_v24, 0.0 }
  0xef   : > { %v440_v32 = vsel %vm437_vm2, %v438_v21, %v439_v28 }
  0xf0   : > { %v455_v34 = vadd.f32 %v451_v31, %v444_v30  ;;  %v445_v35 = vadd.f32 %v440_v32, %v391_v29 }
  0xf2   : > { %v456_v37 = vadd.f32 %v454_v36, %v445_v35  ;;  %v464_v38 = vadd.f32 %v604_v33, %v455_v34 }
  0xf4   : > { %v465_v39 = vadd.f32 %v604_v33, %v456_v37  ;;  %v483_v42 = vmul.f32 %v464_v38, %v464_v38 }
  0xf6   : > { %v616_v40 = vpack.c.bf16 %v465_v39, %v464_v38  ;;  %v476_v41 = vadd.f32 %v465_v39, %v464_v38  ;;  %v484_v43 = vmul.f32 %v465_v39, %v465_v39 }
  0xf8   : > { %617 = vst [vmem:[%s258_s30] sm:$0xff] %v616_v40   ;;  %v477_v44 = vrot.slane %v476_v41, 4  ;;  %v485_v45 = vadd.f32 %v484_v43, %v483_v42 }
  0xfa   : > { %v478_v46 = vadd.f32 %v477_v44, %v476_v41  ;;  %v486_v47 = vrot.slane %v485_v45, 4 }
  0xfc   : > { %v479_v48 = vrot.slane %v478_v46, 2  ;;  %v487_v49 = vadd.f32 %v486_v47, %v485_v45 }
  0xfe   : > { %v480_v50 = vadd.f32 %v479_v48, %v478_v46  ;;  %v488_v51 = vrot.slane %v487_v49, 2 }
 0x100   : > { %v481_v52 = vrot.slane %v480_v50, 1  ;;  %v489_v53 = vadd.f32 %v488_v51, %v487_v49 }
 0x102   : > { %v490_v54 = vrot.slane %v489_v53, 1  ;;  %v482_v55 = vadd.f32 %v481_v52, %v480_v50 }
 0x104   : > { %v491_v56 = vadd.f32 %v490_v54, %v489_v53 }
 0x106   : > { %v492_v57 = vsel %vm437_vm2, %v482_v55, %v491_v56 }
 0x107   : > { %493 = vst [vmem:[%s262_s10] sm:$0x3] %v492_v57 }
 0x108 PF: > { %s17_s21 = sadd.s32 1, %s668_s21  }
 0x109   : > { %p14_p4 = scmp.ge.s32.totalorder %s17_s21, 4  }
 0x10b   :  { %16 = sbr.rel (!%p14_p4) target bundleno = 1 (0x1), region = 82 }

// kernel: conv_block_forward.4
= control target key start
LH: loop header
LB: loop body
LE: loop exit
PB: predicated region body
PF: predicated region fallthrough
CT: control target
= control target key end

     0   :  { %s850_s21 = smov 0   ;;  %s971_s0 = inlined_call_operand.vmem [shape: bf16[2,16,128], index: 0, kind: input, shape index: {}]   ;;  %s972_s1 = inlined_call_operand.vmem [shape: bf16[128,384], index: 1, kind: input, shape index: {}]   ;;  %s973_s2 = inlined_call_operand.vmem [shape: f32[1,128], index: 2, kind: input, shape index: {}]   ;;  %s974_s3 = inlined_call_operand.vmem [shape: f32[1,128], index: 3, kind: input, shape index: {}]   ;;  %s975_s4 = inlined_call_operand.vmem [shape: f32[1,128], index: 4, kind: input, shape index: {}]   ;;  %s976_s5 = inlined_call_operand.vmem [shape: bf16[2,16,128], index: 5, kind: output, shape index: {0}]   ;;  %s977_s6 = inlined_call_operand.vmem [shape: f32[2,2,128], index: 6, kind: output, shape index: {1}]  }
   0x1 LB: > { %s678_s22 = sadd.s32 4294967295, %s810_s21   ;;  %p682_p0 = scmp.ge.s32.totalorder %s810_s21, 1  ;;  %s810_s21 = sphi %s850_s21, %s17_s21  }
   0x2   : > { %p215_p1 = scmp.lt.s32.totalorder %s810_s21, 3 }
   0x4   : > { %p216_p2 = pnand %p682_p0, %p215_p1 }
   0x5   : > { %v772_v0 = vld [vmem:[%s972_s1 + $0x4] ss:$12 sps:$4 sm:$0xff] (!%p216_p2)   ;;  %v812_v1 = vmov (!%p216_p2), 0.0   ;;  %v774_v2 = vld [vmem:[%s972_s1 + $0x8] ss:$12 sps:$4 sm:$0xff] (!%p216_p2)   ;;  %vm813_vm0 = vmmov (!%p216_p2), 0  }
   0x6   : > { %219 = sbr.rel (%p216_p2) target bundleno = 280 (0x118), region = 40  ;;  %741 = vmatprep.subr.bf16.mxu1 (!%p216_p2), %v812_v1  ;;  %757 = vmatprep.mubr.msk.bf16.mxu1 (!%p216_p2), %vm813_vm0, %v812_v1  ;;  %v775_v3 = vld [vmem:[%s972_s1] ss:$12 sps:$4 sm:$0xff] (!%p216_p2)   ;;  %p249_p3 = scmp.lt.s32.totalorder (!%p216_p2), %s678_s22, 1  ;;  %v776_v4 = vld [vmem:[%s972_s1 + $0x1c] ss:$12 sps:$4 sm:$0xff] (!%p216_p2)  }
   0x7   : > { %449 = vmatprep.subr.bf16.mxu0 (!%p216_p2), %v772_v0  ;;  %742 = vmatpush3.bf16.msra.mxu1 (!%p216_p2), %v774_v2  ;;  %v814_v5 = vmov (!%p216_p2), 0   ;;  %v778_v6 = vld [vmem:[%s972_s1 + $0x20] ss:$12 sps:$4 sm:$0xff] (!%p216_p2)   ;;  %v779_v7 = vld [vmem:[%s972_s1 + $0x18] ss:$12 sps:$4 sm:$0xff] (!%p216_p2)   ;;  %vm535_vm1 = vcmask (!%p216_p2), 1040384  }
   0x8   : > { %481 = vmatprep.mubr.bf16.mxu0 (!%p216_p2), %v814_v5  ;;  %450 = vmatpush1.bf16.msra.mxu0 (!%p216_p2), %v775_v3  ;;  %v780_v8 = vld [vmem:[%s972_s1 + $0x34] ss:$12 sps:$4 sm:$0xff] (!%p216_p2)   ;;  %v782_v9 = vld [vmem:[%s972_s1 + $0x38] ss:$12 sps:$4 sm:$0xff] (!%p216_p2)   ;;  %v783_v10 = vld [vmem:[%s972_s1 + $0x30] ss:$12 sps:$4 sm:$0xff] (!%p216_p2)  }
   0x9   : > { %743 = vmatprep.subr.bf16.mxu1 (!%p216_p2), %v812_v1  ;;  %451 = vmatprep.subr.bf16.mxu0 (!%p216_p2), %v776_v4  ;;  %v784_v11 = vld [vmem:[%s972_s1 + $0x4c] ss:$12 sps:$4 sm:$0xff] (!%p216_p2)   ;;  %v786_v12 = vld [vmem:[%s972_s1 + $0x50] ss:$12 sps:$4 sm:$0xff] (!%p216_p2)   ;;  %v787_v13 = vld [vmem:[%s972_s1 + $0x48] ss:$12 sps:$4 sm:$0xff] (!%p216_p2)  }
   0xa   : > { %v788_v14 = vld [vmem:[%s972_s1 + $0x64] ss:$12 sps:$4 sm:$0xff] (!%p216_p2)   ;;  %v790_v15 = vld [vmem:[%s972_s1 + $0x68] ss:$12 sps:$4 sm:$0xff] (!%p216_p2)   ;;  %v791_v16 = vld [vmem:[%s972_s1 + $0x60] ss:$12 sps:$4 sm:$0xff] (!%p216_p2)  }
   0xb   : > { %744 = vmatpush3.bf16.msra.mxu1 (!%p216_p2), %v778_v6  ;;  %v792_v17 = vld [vmem:[%s972_s1 + $0x7c] ss:$12 sps:$4 sm:$0xff] (!%p216_p2)   ;;  %v794_v19 = vld [vmem:[%s972_s1 + $0x80] ss:$12 sps:$4 sm:$0xff] (!%p216_p2)   ;;  %v795_v23 = vld [vmem:[%s972_s1 + $0x78] ss:$12 sps:$4 sm:$0xff] (!%p216_p2)  }
   0xc   : > { %452 = vmatpush1.bf16.msra.mxu0 (!%p216_p2), %v779_v7  ;;  %745 = vmatprep.subr.bf16.mxu1 (!%p216_p2), %v812_v1  ;;  %v688_v22 = vld [vmem:[%s974_s3] ss:$0 sm:$0xff] (!%p216_p2)  ;;  %v798_v28 = vld [vmem:[%s972_s1 + $0x98] ss:$12 sps:$4 sm:$0xff] (!%p216_p2)   ;;  %v799_v31 = vld [vmem:[%s972_s1 + $0x90] ss:$12 sps:$4 sm:$0xff] (!%p216_p2)  }
   0xd   : > { %s979_s22 = smov (!%p249_p3, %s678_s22), 1  ;;  %453 = vmatprep.subr.bf16.mxu0 %v780_v8  ;;  %v689_v24 = vld [vmem:[%s975_s4] ss:$0 sm:$0xff]  ;;  %v800_v32 = vld [vmem:[%s972_s1 + $0xac] ss:$12 sps:$4 sm:$0xff]   ;;  %vm546_vm2 = vcmask 1046528  }
   0xe   : > { %s719_s25 = sshll.u32 %s979_s22, 3  ;;  %v796_v25 = vld [vmem:[%s972_s1 + $0x94] ss:$12 sps:$4 sm:$0xff]   ;;  %v802_v35 = vld [vmem:[%s972_s1 + $0xb0] ss:$12 sps:$4 sm:$0xff]   ;;  %s687_s17 = sshll.u32 %s979_s22, 1 }
   0xf   : > { %746 = vmatpush3.bf16.msra.mxu1 %v782_v9  ;;  %s253_s8 = scalar_lea.vmem %s971_s0, %s719_s25  ;;  %v803_v36 = vld [vmem:[%s972_s1 + $0xa8] ss:$12 sps:$4 sm:$0xff]   ;;  %v714_v54 = vld [vmem:[%s973_s2] ss:$0 sm:$0xff]  ;;  %s258_s16 = scalar_lea.vmem %s976_s5, %s719_s25 }
  0x10   : > { %454 = vmatpush1.bf16.msra.mxu0 %v783_v10  ;;  %747 = vmatprep.subr.bf16.mxu1 %v812_v1  ;;  %v724_v18 = vld [vmem:[%s253_s8] sm:$0xff]   ;;  %s262_s19 = scalar_lea.vmem %s977_s6, %s687_s17 }
  0x11   : > { %455 = vmatprep.subr.bf16.mxu0 %v784_v11  ;;  %v725_v20 = vunpack.c.l.bf16 %v724_v18  ;;  %v726_v21 = vunpack.c.h.bf16 %v724_v18 }
  0x13   : > { %748 = vmatpush3.bf16.msra.mxu1 %v786_v12  ;;  %v275_v26 = vmul.f32 %v725_v20, %v688_v22  ;;  %v276_v27 = vmul.f32 %v726_v21, %v688_v22 }
  0x14   : > { %456 = vmatpush1.bf16.msra.mxu0 %v787_v13  ;;  %749 = vmatprep.subr.bf16.mxu1 %v812_v1 }
  0x15   : > { %457 = vmatprep.subr.bf16.mxu0 %v788_v14  ;;  %v284_v29 = vadd.f32 %v689_v24, %v275_v26  ;;  %v285_v30 = vadd.f32 %v689_v24, %v276_v27 }
  0x17   : > { %750 = vmatpush3.bf16.msra.mxu1 %v790_v15  ;;  %v286_v33 = vmax.f32 %v284_v29, 0.0  ;;  %v287_v34 = vmax.f32 %v285_v30, 0.0 }
  0x18   : > { %458 = vmatpush1.bf16.msra.mxu0 %v791_v16  ;;  %751 = vmatprep.subr.bf16.mxu1 %v812_v1 }
  0x19   : > { %459 = vmatprep.subr.bf16.mxu0 %v792_v17  ;;  %v288_v37 = vpack.c.bf16 %v287_v34, %v286_v33 }
  0x1b   : > { %752 = vmatpush3.bf16.msra.mxu1 %v794_v19 }
  0x1c   : > { %460 = vmatpush1.bf16.msra.mxu0 %v795_v23  ;;  %753 = vmatprep.subr.bf16.mxu1 %v812_v1 }
  0x1d   : > { %461 = vmatprep.subr.bf16.mxu0 %v796_v25 }
  0x1f   : > { %754 = vmatpush3.bf16.msra.mxu1 %v798_v28 }
  0x20   : > { %462 = vmatpush1.bf16.msra.mxu0 %v799_v31  ;;  %755 = vmatprep.subr.bf16.mxu1 %v812_v1 }
  0x21   : > { %463 = vmatprep.subr.bf16.mxu0 %v800_v32 }
  0x23   : > { %756 = vmatpush3.bf16.msra.mxu1 %v802_v35 }
  0x24   : > { %464 = vmatpush1.bf16.msra.mxu0 %v803_v36 }
  0x26   : > { %758 = vmatmul.mubr.bf16.vlgmr.msra.gmra.mrb[0].mxu1 %v288_v37 }
  0x27   : > { %482 = vmatmul.mubr.bf16.vlgmr.msra.gmra.mrb[0].mxu0 %v288_v37 }
  0xf9   : > { %v526_v38 = vpop.f32.mrb[0].mxu1 }
  0xfa   : > { %v547_v39 = vrot.slane %v526_v38, 1  ;;  %v483_v40 = vpop.f32.mrb[0].mxu0  ;;  %v759_v41 = vpop.f32.mrb[1].mxu1 }
  0xfb   : > { %v536_v42 = vrot.slane %v483_v40, 7  ;;  %v485_v43 = vpop.f32.mrb[1].mxu0  ;;  %v529_v44 = vpop.f32.mrb[2].mxu1 }
  0xfc   : > { %v548_v45 = vrot.slane %v529_v44, 1  ;;  %v487_v46 = vpop.f32.mrb[2].mxu0  ;;  %v760_v47 = vpop.f32.mrb[3].mxu1 }
  0xfd   : > { %v541_v48 = vsel %vm535_vm1, 0.0, %v536_v42  ;;  %v537_v49 = vrot.slane %v487_v46, 7  ;;  %v489_v50 = vpop.f32.mrb[3].mxu0 }
  0xfe   : > { %v542_v51 = vadd.f32 %v541_v48, %v485_v43  ;;  %v549_v52 = vsel %vm546_vm2, %v547_v39, %v548_v45  ;;  %v552_v57 = vsel %vm546_vm2, %v548_v45, 0.0 }
  0xff   : > { %v538_v53 = vsel %vm535_vm1, %v536_v42, %v537_v49 }
 0x100   : > { %v553_v55 = vadd.f32 %v549_v52, %v542_v51  ;;  %v543_v56 = vadd.f32 %v538_v53, %v489_v50 }
 0x102   : > { %v554_v58 = vadd.f32 %v552_v57, %v543_v56  ;;  %v562_v59 = vadd.f32 %v714_v54, %v553_v55 }
 0x104   : > { %v563_v60 = vadd.f32 %v714_v54, %v554_v58  ;;  %v581_v63 = vmul.f32 %v562_v59, %v562_v59 }
 0x106   : > { %v730_v61 = vpack.c.bf16 %v563_v60, %v562_v59  ;;  %v574_v62 = vadd.f32 %v563_v60, %v562_v59  ;;  %v582_v0 = vmul.f32 %v563_v60, %v563_v60 }
 0x108   : > { %731 = vst [vmem:[%s258_s16] sm:$0xff] %v730_v61   ;;  %v575_v1 = vrot.slane %v574_v62, 4  ;;  %v583_v2 = vadd.f32 %v582_v0, %v581_v63 }
 0x10a   : > { %v576_v3 = vadd.f32 %v575_v1, %v574_v62  ;;  %v584_v4 = vrot.slane %v583_v2, 4 }
 0x10c   : > { %v577_v5 = vrot.slane %v576_v3, 2  ;;  %v585_v6 = vadd.f32 %v584_v4, %v583_v2 }
 0x10e   : > { %v578_v7 = vadd.f32 %v577_v5, %v576_v3  ;;  %v586_v8 = vrot.slane %v585_v6, 2 }
 0x110   : > { %v579_v9 = vrot.slane %v578_v7, 1  ;;  %v587_v10 = vadd.f32 %v586_v8, %v585_v6 }
 0x112   : > { %v588_v11 = vrot.slane %v587_v10, 1  ;;  %v580_v12 = vadd.f32 %v579_v9, %v578_v7 }
 0x114   : > { %v589_v13 = vadd.f32 %v588_v11, %v587_v10 }
 0x116   : > { %v590_v14 = vsel %vm535_vm1, %v580_v12, %v589_v13 }
 0x117   : > { %591 = vst [vmem:[%s262_s19] sm:$0x3] %v590_v14 }
 0x118 PF: > { %s17_s21 = sadd.s32 1, %s810_s21  }
 0x119   : > { %p14_p4 = scmp.ge.s32.totalorder %s17_s21, 4  }
 0x11b   :  { %16 = sbr.rel (!%p14_p4) target bundleno = 1 (0x1), region = 82 }

// kernel: conv_block_forward.5
= control target key start
LH: loop header
LB: loop body
LE: loop exit
PB: predicated region body
PF: predicated region fallthrough
CT: control target
= control target key end

     0   :  { %s307_s12 = smov 0   ;;  %s324_s0 = inlined_call_operand.vmem [shape: bf16[2,16,128], index: 0, kind: input, shape index: {}]   ;;  %s325_s1 = inlined_call_operand.vmem [shape: f32[1,128], index: 1, kind: input, shape index: {}]   ;;  %s326_s2 = inlined_call_operand.vmem [shape: f32[1,128], index: 2, kind: input, shape index: {}]   ;;  %s327_s3 = inlined_call_operand.vmem [shape: f32[2,16,128], index: 3, kind: output, shape index: {}]  }
   0x1 LB: > { %s252_s13 = sadd.s32 4294967295, %s285_s12   ;;  %p256_p0 = scmp.ge.s32.totalorder %s285_s12, 1  ;;  %s285_s12 = sphi %s307_s12, %s13_s12  }
   0x2   : > { %p137_p1 = scmp.lt.s32.totalorder %s285_s12, 3 }
   0x4   : > { %p138_p2 = pnand %p256_p0, %p137_p1 }
   0x5   : > { %p161_p3 = scmp.lt.s32.totalorder (!%p138_p2), %s252_s13, 1  ;;  %v261_v1 = vld [vmem:[%s325_s1] ss:$0 sm:$0xff] (!%p138_p2) }
   0x6   : > { %141 = sbr.rel (%p138_p2) target bundleno = 26 (0x1a), region = 32  ;;  %v262_v4 = vld [vmem:[%s326_s2] ss:$0 sm:$0xff] (!%p138_p2) }
   0xd   : > { %s329_s13 = smov (!%p161_p3, %s252_s13), 1 }
   0xe   : > { %s265_s14 = sshll.u32 %s329_s13, 3  ;;  %s266_s22 = sshll.u32 %s329_s13, 4 }
   0xf   : > { %s165_s17 = scalar_lea.vmem %s324_s0, %s265_s14  ;;  %s170_s25 = scalar_lea.vmem %s327_s3, %s266_s22 }
  0x10   : > { %v268_v0 = vld [vmem:[%s165_s17] sm:$0xff]  }
  0x11   : > { %v269_v2 = vunpack.c.l.bf16 %v268_v0  ;;  %v270_v3 = vunpack.c.h.bf16 %v268_v0 }
  0x13   : > { %v182_v5 = vmul.f32 %v269_v2, %v261_v1  ;;  %v183_v6 = vmul.f32 %v270_v3, %v261_v1 }
  0x15   : > { %v191_v7 = vadd.f32 %v262_v4, %v182_v5  ;;  %v192_v8 = vadd.f32 %v262_v4, %v183_v6 }
  0x17   : > { %v193_v9 = vmax.f32 %v191_v7, 0.0  ;;  %v194_v10 = vmax.f32 %v192_v8, 0.0 }
  0x19   : > { %195 = vst [vmem:[%s170_s25] sm:$0xff] %v193_v9  ;;  %196 = vst [vmem:[%s170_s25 + $0x8] sm:$0xff] %v194_v10 }
  0x1a PF: > { %s13_s12 = sadd.s32 1, %s285_s12  }
  0x1b   : > { %p10_p4 = scmp.ge.s32.totalorder %s13_s12, 4  }
  0x1d   :  { %12 = sbr.rel (!%p10_p4) target bundleno = 1 (0x1), region = 62 }

</bundles_post_ra>
